<compile_context>
chip_gen: v5e
topology: v5e:2x2
jax: 0.10.0
libtpu: 0.0.40
codegen_flags: <defaults>
</compile_context>

<pallas_src>
import jax
import jax.numpy as jnp
from jax import lax
from jax.experimental import pallas as pl
from jax.experimental.pallas import tpu as pltpu

EPS = 1e-5  # nn.LayerNorm default eps


def _layernorm_channels(h, g, b):
    """LayerNorm over the channel (sublane) axis of h: (C, L_total); g, b: (C, 1).

    Two-pass mean / centered-variance (matches PyTorch LayerNorm numerics better
    than E[x^2]-E[x]^2; the XLU has slack here — this kernel is HBM/MXU bound)."""
    inv_c = 1.0 / h.shape[0]
    mu = jnp.sum(h, axis=0, keepdims=True) * inv_c
    d = h - mu
    var = jnp.sum(d * d, axis=0, keepdims=True) * inv_c
    return d * lax.rsqrt(var + EPS) * g + b


def _make_kernel(L, matmul_dtype):
    mmdt = jnp.dtype(matmul_dtype)
    is_f32_mm = mmdt == jnp.dtype(jnp.float32)

    def kernel(x_ref, w1_ref, w2s_ref, w3_ref, ln12_ref, ln3_ref, o_ref):
        lb = x_ref.shape[1]            # nb * L lanes in this block
        width = w1_ref.shape[0]

        def mm(a, b):
            # MXU matmul, f32 accumulation.
            return jnp.dot(a, b, preferred_element_type=jnp.float32)

        # Weights already arrive in matmul_dtype from the host; LN params in f32.
        w1 = w1_ref[...]                                   # (W, Cin)
        w2s = w2s_ref[...]                                 # (W, 3W)  K-stacked taps
        w3 = w3_ref[...]                                   # (Cout, W)
        ln12 = ln12_ref[...]                               # (W, 4) = g1|b1|g2|b2
        ln3 = ln3_ref[...]                                 # (Cout, 2) = g3|b3
        g1, b1 = ln12[:, 0:1], ln12[:, 1:2]
        g2, b2 = ln12[:, 2:3], ln12[:, 3:4]
        g3, b3 = ln3[:, 0:1], ln3[:, 1:2]

        # Within-sequence position masks (batch is folded along lanes).
        pos = lax.broadcasted_iota(jnp.int32, (width, lb), 1) % L
        is_first = pos == 0
        is_last = pos == (L - 1)

        # Single read of x: used for conv1 input and the identity residual.
        x_f32 = x_ref[...].astype(jnp.float32)             # (Cin, lb)
        x_mm = x_f32 if is_f32_mm else x_f32.astype(mmdt)

        # --- conv1 (1x1) + LayerNorm + ReLU : one matmul over the whole slab ---
        h = jnp.maximum(_layernorm_channels(mm(w1, x_mm), g1, b1), 0.0)   # (W, lb)

        # --- conv2 (k=3, pad=1): lane-rolled taps, K-stacked single matmul ------
        h_prev = jnp.where(is_first, 0.0, pltpu.roll(h, shift=1, axis=1))
        h_next = jnp.where(is_last, 0.0, pltpu.roll(h, shift=lb - 1, axis=1))
        hcat = jnp.concatenate([h_prev, h, h_next], axis=0)               # (3W, lb)
        hcat = hcat if is_f32_mm else hcat.astype(mmdt)
        h2 = jnp.maximum(_layernorm_channels(mm(w2s, hcat), g2, b2), 0.0)

        # --- conv3 (1x1) + LayerNorm --------------------------------------------
        h2m = h2 if is_f32_mm else h2.astype(mmdt)
        h3 = _layernorm_channels(mm(w3, h2m), g3, b3)                     # (Cout, lb)

        # --- residual (identity, no downsample) + ReLU, lane-dense store --------
        o_ref[...] = jnp.maximum(h3 + x_f32, 0.0).astype(o_ref.dtype)

    return kernel


def _choose_seqs_per_block(N, L, Cin, Cout, in_itemsize, out_itemsize,
                           budget_bytes=4 << 20):
    """Sequences per grid step, sized from a VMEM byte budget (~4 MiB of in+out
    per buffer).  The lane-block nb*L must be a multiple of 128 (or cover the
    whole array); prefer an even number of >=2 grid steps (v7x megacore)."""
    per_seq = (Cin * in_itemsize + Cout * out_itemsize) * L
    nb_budget = max(1, int(budget_bytes // max(per_seq, 1)))
    valid = [d for d in range(1, N + 1)
             if N % d == 0 and ((d * L) % 128 == 0 or d == N)]
    within = [d for d in valid if d <= nb_budget] or [min(valid)]

    def steps(d):
        return N // d

    even_multi = [d for d in within if steps(d) >= 2 and steps(d) % 2 == 0]
    pool = even_multi if even_multi else within
    return max(pool)


def _pick_vmem_limit():
    """Generation-aware scoped-VMEM limit: <=48 MiB on v7x (64 MiB physical),
    up to 96 MiB on v5e/v6e (128 MiB physical); safe fallback if undetectable."""
    try:
        cap = pltpu.get_tpu_info().vmem_capacity_bytes
    except Exception:
        cap = 64 * 1024 * 1024
    return int(min(96 * 1024 * 1024, cap * 3 // 4))


def bottleneck_pallas(x_ncl, params, *, matmul_dtype=jnp.bfloat16):
    """x_ncl: (N, Cin, L) (PyTorch Conv1d layout).  Returns (N, Cout, L).

    params are PyTorch-layout tensors:
      w1: (W, Cin)      conv1 weight (k=1 squeezed)
      w2: (W, W, 3)     conv2 weight (out, in, k)
      w3: (Cout, W)     conv3 weight (k=1 squeezed)
      g1,b1,g2,b2: (W,)  LayerNorm affine;  g3,b3: (Cout,)
    """
    w1, w2, w3, g1, b1, g2, b2, g3, b3 = params
    N, Cin, L = x_ncl.shape
    Wd = w1.shape[0]
    Cout = w3.shape[0]
    assert Cin == Cout, "identity residual requires inplanes == planes*expansion (downsample=None)"

    mmdt = jnp.dtype(matmul_dtype)
    # One-time host-side parameter repacking / pre-cast (tiny):
    w1m = w1.astype(mmdt)                                            # (W, Cin)
    w2s = jnp.concatenate([w2[:, :, 0], w2[:, :, 1], w2[:, :, 2]],   # (W, 3W)
                          axis=1).astype(mmdt)
    w3m = w3.astype(mmdt)                                            # (Cout, W)
    ln12 = jnp.stack([g1, b1, g2, b2], axis=1).astype(jnp.float32)   # (W, 4)
    ln3 = jnp.stack([g3, b3], axis=1).astype(jnp.float32)            # (Cout, 2)

    # Channels-major slab with the batch folded onto the lane axis (done once).
    x2 = jnp.transpose(x_ncl, (1, 0, 2)).reshape(Cin, N * L)         # (Cin, N*L)

    nb = _choose_seqs_per_block(N, L, Cin, Cout,
                                jnp.dtype(x2.dtype).itemsize,
                                jnp.dtype(x_ncl.dtype).itemsize)
    LB = nb * L
    grid = (N // nb,)

    def const_spec(arr):
        nd = arr.ndim
        return pl.BlockSpec(arr.shape, lambda i, _nd=nd: (0,) * _nd)

    out2 = pl.pallas_call(
        _make_kernel(L, mmdt),
        out_shape=jax.ShapeDtypeStruct((Cout, N * L), x_ncl.dtype),
        grid_spec=pltpu.PrefetchScalarGridSpec(
            num_scalar_prefetch=0,
            grid=grid,
            in_specs=[
                pl.BlockSpec((Cin, LB), lambda i: (0, i)),
                const_spec(w1m),
                const_spec(w2s),
                const_spec(w3m),
                const_spec(ln12),
                const_spec(ln3),
            ],
            out_specs=pl.BlockSpec((Cout, LB), lambda i: (0, i)),
        ),
        compiler_params=pltpu.CompilerParams(
            dimension_semantics=("parallel",),
            vmem_limit_bytes=_pick_vmem_limit(),
        ),
    )(x2, w1m, w2s, w3m, ln12, ln3)

    return jnp.transpose(out2.reshape(Cout, N, L), (1, 0, 2))


def bottleneck_ref(x_ncl, params):
    """Pure-JAX reference in native NCL layout (same math as the PyTorch module)."""
    w1, w2, w3, g1, b1, g2, b2, g3, b3 = params
    x = x_ncl.astype(jnp.float32)
    L = x.shape[-1]

    def ln_c(h, g, b):
        mu = jnp.mean(h, axis=1, keepdims=True)
        var = jnp.mean((h - mu) ** 2, axis=1, keepdims=True)
        return (h - mu) * lax.rsqrt(var + EPS) * g[None, :, None] + b[None, :, None]

    h = jnp.einsum('oc,ncl->nol', w1, x)
    h = jnp.maximum(ln_c(h, g1, b1), 0.0)
    hp = jnp.pad(h, ((0, 0), (0, 0), (1, 1)))
    acc = sum(jnp.einsum('oc,ncl->nol', w2[:, :, k], hp[:, :, k:k + L]) for k in range(3))
    h2 = jnp.maximum(ln_c(acc, g2, b2), 0.0)
    h3 = ln_c(jnp.einsum('oc,ncl->nol', w3, h2), g3, b3)
    return jnp.maximum(h3 + x, 0.0)


if __name__ == "__main__":
    # Config: inplanes == planes * expansion so the identity path needs no
    # downsample (downsample=None in the module).
    inplanes, planes, expansion = 16, 4, 4
    width = planes                      # base_width=64, groups=1 -> width = planes
    cout = planes * expansion           # 16 == inplanes
    N, L = 2, 16

    key = jax.random.PRNGKey(0)
    ks = jax.random.split(key, 10)
    # PyTorch Conv1d weight layouts (out, in, k), k=1 squeezed.
    w1 = (0.2 * jax.random.normal(ks[0], (width, inplanes))).astype(jnp.float32)
    w2 = (0.2 * jax.random.normal(ks[1], (width, width, 3))).astype(jnp.float32)
    w3 = (0.2 * jax.random.normal(ks[2], (cout, width))).astype(jnp.float32)
    g1 = (1.0 + 0.1 * jax.random.normal(ks[3], (width,))).astype(jnp.float32)
    b1 = (0.1 * jax.random.normal(ks[4], (width,))).astype(jnp.float32)
    g2 = (1.0 + 0.1 * jax.random.normal(ks[5], (width,))).astype(jnp.float32)
    b2 = (0.1 * jax.random.normal(ks[6], (width,))).astype(jnp.float32)
    g3 = (1.0 + 0.1 * jax.random.normal(ks[7], (cout,))).astype(jnp.float32)
    b3 = (0.1 * jax.random.normal(ks[8], (cout,))).astype(jnp.float32)
    params = (w1, w2, w3, g1, b1, g2, b2, g3, b3)

    x = jax.random.normal(ks[9], (N, inplanes, L), dtype=jnp.float32)

    ref = bottleneck_ref(x, params)

    # f32 MXU path: strict semantics check vs. the f32 reference.
    out_f32 = jax.block_until_ready(bottleneck_pallas(x, params, matmul_dtype=jnp.float32))
    assert out_f32.shape == (N, cout, L)
    assert jnp.allclose(out_f32, ref, atol=1e-4, rtol=1e-4), "f32 path mismatch vs reference"

    # Default bf16 MXU operands (recommended on v5e/v6e/v7x): looser tolerance.
    out_bf16 = jax.block_until_ready(bottleneck_pallas(x, params))
    assert out_bf16.shape == (N, cout, L)
    assert jnp.allclose(out_bf16, ref, atol=1e-1, rtol=1e-1), "bf16 path mismatch vs reference"

    print("KERNEL_OK")
</pallas_src>

<mosaic_0001>
module attributes {stable_mosaic.version = 11 : i64} {
  func.func @kernel(%arg0: i32, %arg1: memref<16x32xf32, #tpu.memory_space<vmem>>, %arg2: memref<4x16xf32, #tpu.memory_space<vmem>>, %arg3: memref<4x12xf32, #tpu.memory_space<vmem>>, %arg4: memref<16x4xf32, #tpu.memory_space<vmem>>, %arg5: memref<4x4xf32, #tpu.memory_space<vmem>>, %arg6: memref<16x2xf32, #tpu.memory_space<vmem>>, %arg7: memref<16x32xf32, #tpu.memory_space<vmem>>) attributes {dimension_semantics = [#tpu.dimension_semantics<parallel>], iteration_bounds = array<i64: 1>, scalar_prefetch = 0 : i64, scratch_operands = 0 : i64, tpu.core_type = #tpu.core_type<tc>, window_params = [{transform_indices = @transform_0, window_bounds = array<i64: 16, 32>}, {pipeline_mode = #tpu.pipeline_mode<synchronous>, transform_indices = @transform_1, window_bounds = array<i64: 4, 16>}, {pipeline_mode = #tpu.pipeline_mode<synchronous>, transform_indices = @transform_2, window_bounds = array<i64: 4, 12>}, {pipeline_mode = #tpu.pipeline_mode<synchronous>, transform_indices = @transform_3, window_bounds = array<i64: 16, 4>}, {pipeline_mode = #tpu.pipeline_mode<synchronous>, transform_indices = @transform_4, window_bounds = array<i64: 4, 4>}, {pipeline_mode = #tpu.pipeline_mode<synchronous>, transform_indices = @transform_5, window_bounds = array<i64: 16, 2>}, {transform_indices = @transform_6, window_bounds = array<i64: 16, 32>}]} {
    %c0 = arith.constant 0 : index
    %c0_0 = arith.constant 0 : index
    %0 = vector.load %arg2[%c0, %c0_0] : memref<4x16xf32, #tpu.memory_space<vmem>>, vector<4x16xf32>
    %c0_1 = arith.constant 0 : index
    %c0_2 = arith.constant 0 : index
    %1 = vector.load %arg3[%c0_1, %c0_2] : memref<4x12xf32, #tpu.memory_space<vmem>>, vector<4x12xf32>
    %c0_3 = arith.constant 0 : index
    %c0_4 = arith.constant 0 : index
    %2 = vector.load %arg4[%c0_3, %c0_4] : memref<16x4xf32, #tpu.memory_space<vmem>>, vector<16x4xf32>
    %c0_5 = arith.constant 0 : index
    %c0_6 = arith.constant 0 : index
    %3 = vector.load %arg5[%c0_5, %c0_6] : memref<4x4xf32, #tpu.memory_space<vmem>>, vector<4x4xf32>
    %c0_7 = arith.constant 0 : index
    %c0_8 = arith.constant 0 : index
    %4 = vector.load %arg6[%c0_7, %c0_8] : memref<16x2xf32, #tpu.memory_space<vmem>>, vector<16x2xf32>
    %5 = vector.extract_strided_slice %3 {offsets = [0, 0], sizes = [4, 1], strides = [1, 1]} : vector<4x4xf32> to vector<4x1xf32>
    %6 = vector.extract_strided_slice %3 {offsets = [0, 1], sizes = [4, 1], strides = [1, 1]} : vector<4x4xf32> to vector<4x1xf32>
    %7 = vector.extract_strided_slice %3 {offsets = [0, 2], sizes = [4, 1], strides = [1, 1]} : vector<4x4xf32> to vector<4x1xf32>
    %8 = vector.extract_strided_slice %3 {offsets = [0, 3], sizes = [4, 1], strides = [1, 1]} : vector<4x4xf32> to vector<4x1xf32>
    %9 = vector.extract_strided_slice %4 {offsets = [0, 0], sizes = [16, 1], strides = [1, 1]} : vector<16x2xf32> to vector<16x1xf32>
    %10 = vector.extract_strided_slice %4 {offsets = [0, 1], sizes = [16, 1], strides = [1, 1]} : vector<16x2xf32> to vector<16x1xf32>
    %11 = tpu.iota {dimensions = array<i32: 1>} : vector<4x32xi32>
    %c16_i32 = arith.constant 16 : i32
    %c0_i32 = arith.constant 0 : i32
    %12 = arith.cmpi eq, %c16_i32, %c0_i32 : i32
    %c1_i32 = arith.constant 1 : i32
    %13 = arith.select %12, %c1_i32, %c16_i32 : i32
    %14 = vector.broadcast %13 : i32 to vector<4x32xi32>
    %15 = arith.remsi %11, %14 : vector<4x32xi32>
    %c0_i32_9 = arith.constant 0 : i32
    %16 = vector.broadcast %c0_i32_9 : i32 to vector<4x32xi32>
    %17 = arith.cmpi ne, %15, %16 : vector<4x32xi32>
    %c0_i32_10 = arith.constant 0 : i32
    %18 = vector.broadcast %c0_i32_10 : i32 to vector<4x32xi32>
    %19 = arith.cmpi slt, %15, %18 : vector<4x32xi32>
    %c0_i32_11 = arith.constant 0 : i32
    %20 = arith.cmpi slt, %13, %c0_i32_11 : i32
    %21 = vector.broadcast %20 : i1 to vector<4x32xi1>
    %22 = vector.broadcast %21 : vector<4x32xi1> to vector<4x32xi1>
    %23 = arith.xori %19, %22 : vector<4x32xi1>
    %24 = arith.andi %23, %17 : vector<4x32xi1>
    %25 = vector.broadcast %13 : i32 to vector<4x32xi32>
    %26 = arith.addi %15, %25 : vector<4x32xi32>
    %27 = arith.select %24, %26, %15 : vector<4x32xi1>, vector<4x32xi32>
    %c0_i32_12 = arith.constant 0 : i32
    %28 = vector.broadcast %c0_i32_12 : i32 to vector<4x32xi32>
    %29 = arith.cmpi eq, %27, %28 : vector<4x32xi32>
    %c15_i32 = arith.constant 15 : i32
    %30 = vector.broadcast %c15_i32 : i32 to vector<4x32xi32>
    %31 = arith.cmpi eq, %27, %30 : vector<4x32xi32>
    %c0_13 = arith.constant 0 : index
    %c0_14 = arith.constant 0 : index
    %32 = vector.load %arg1[%c0_13, %c0_14] : memref<16x32xf32, #tpu.memory_space<vmem>>, vector<16x32xf32>
    %cst = arith.constant dense<0.000000e+00> : vector<4x32xf32>
    %33 = tpu.matmul %0, %32, %cst {dimension_numbers = #tpu.dot_dimension_numbers<[1], [0], [0], [1], [0, 0, 1, 1], [], []>} : vector<4x16xf32>, vector<16x32xf32>, vector<4x32xf32> -> vector<4x32xf32>
    %cst_15 = arith.constant dense<0.000000e+00> : vector<32xf32>
    %34 = vector.multi_reduction <add>, %33, %cst_15 [0] : vector<4x32xf32> to vector<32xf32>
    %35 = vector.shape_cast %34 : vector<32xf32> to vector<1x32xf32>
    %cst_16 = arith.constant 2.500000e-01 : f32
    %36 = vector.broadcast %cst_16 : f32 to vector<1x32xf32>
    %37 = arith.mulf %35, %36 : vector<1x32xf32>
    %38 = vector.broadcast %37 : vector<1x32xf32> to vector<4x32xf32>
    %39 = arith.subf %33, %38 : vector<4x32xf32>
    %40 = arith.mulf %39, %39 : vector<4x32xf32>
    %cst_17 = arith.constant dense<0.000000e+00> : vector<32xf32>
    %41 = vector.multi_reduction <add>, %40, %cst_17 [0] : vector<4x32xf32> to vector<32xf32>
    %42 = vector.shape_cast %41 : vector<32xf32> to vector<1x32xf32>
    %cst_18 = arith.constant 2.500000e-01 : f32
    %43 = vector.broadcast %cst_18 : f32 to vector<1x32xf32>
    %44 = arith.mulf %42, %43 : vector<1x32xf32>
    %cst_19 = arith.constant 9.99999974E-6 : f32
    %45 = vector.broadcast %cst_19 : f32 to vector<1x32xf32>
    %46 = arith.addf %44, %45 : vector<1x32xf32>
    %47 = math.rsqrt %46 : vector<1x32xf32>
    %48 = vector.broadcast %47 : vector<1x32xf32> to vector<4x32xf32>
    %49 = arith.mulf %39, %48 : vector<4x32xf32>
    %50 = vector.broadcast %5 : vector<4x1xf32> to vector<4x32xf32>
    %51 = arith.mulf %49, %50 : vector<4x32xf32>
    %52 = vector.broadcast %6 : vector<4x1xf32> to vector<4x32xf32>
    %53 = arith.addf %51, %52 : vector<4x32xf32>
    %cst_20 = arith.constant 0.000000e+00 : f32
    %54 = vector.broadcast %cst_20 : f32 to vector<4x32xf32>
    %55 = arith.maximumf %53, %54 : vector<4x32xf32>
    %c1_i32_21 = arith.constant 1 : i32
    %56 = tpu.dynamic_rotate %55 by %c1_i32_21 dim 1 : vector<4x32xf32>, i32 -> vector<4x32xf32>
    %cst_22 = arith.constant 0.000000e+00 : f32
    %57 = vector.broadcast %cst_22 : f32 to vector<4x32xf32>
    %58 = arith.select %29, %57, %56 : vector<4x32xi1>, vector<4x32xf32>
    %c31_i32 = arith.constant 31 : i32
    %59 = tpu.dynamic_rotate %55 by %c31_i32 dim 1 : vector<4x32xf32>, i32 -> vector<4x32xf32>
    %cst_23 = arith.constant 0.000000e+00 : f32
    %60 = vector.broadcast %cst_23 : f32 to vector<4x32xf32>
    %61 = arith.select %31, %60, %59 : vector<4x32xi1>, vector<4x32xf32>
    %62 = tpu.concatenate %58, %55, %61 in 0 : vector<4x32xf32>, vector<4x32xf32>, vector<4x32xf32> -> vector<12x32xf32>
    %cst_24 = arith.constant dense<0.000000e+00> : vector<4x32xf32>
    %63 = tpu.matmul %1, %62, %cst_24 {dimension_numbers = #tpu.dot_dimension_numbers<[1], [0], [0], [1], [0, 0, 1, 1], [], []>} : vector<4x12xf32>, vector<12x32xf32>, vector<4x32xf32> -> vector<4x32xf32>
    %cst_25 = arith.constant dense<0.000000e+00> : vector<32xf32>
    %64 = vector.multi_reduction <add>, %63, %cst_25 [0] : vector<4x32xf32> to vector<32xf32>
    %65 = vector.shape_cast %64 : vector<32xf32> to vector<1x32xf32>
    %cst_26 = arith.constant 2.500000e-01 : f32
    %66 = vector.broadcast %cst_26 : f32 to vector<1x32xf32>
    %67 = arith.mulf %65, %66 : vector<1x32xf32>
    %68 = vector.broadcast %67 : vector<1x32xf32> to vector<4x32xf32>
    %69 = arith.subf %63, %68 : vector<4x32xf32>
    %70 = arith.mulf %69, %69 : vector<4x32xf32>
    %cst_27 = arith.constant dense<0.000000e+00> : vector<32xf32>
    %71 = vector.multi_reduction <add>, %70, %cst_27 [0] : vector<4x32xf32> to vector<32xf32>
    %72 = vector.shape_cast %71 : vector<32xf32> to vector<1x32xf32>
    %cst_28 = arith.constant 2.500000e-01 : f32
    %73 = vector.broadcast %cst_28 : f32 to vector<1x32xf32>
    %74 = arith.mulf %72, %73 : vector<1x32xf32>
    %cst_29 = arith.constant 9.99999974E-6 : f32
    %75 = vector.broadcast %cst_29 : f32 to vector<1x32xf32>
    %76 = arith.addf %74, %75 : vector<1x32xf32>
    %77 = math.rsqrt %76 : vector<1x32xf32>
    %78 = vector.broadcast %77 : vector<1x32xf32> to vector<4x32xf32>
    %79 = arith.mulf %69, %78 : vector<4x32xf32>
    %80 = vector.broadcast %7 : vector<4x1xf32> to vector<4x32xf32>
    %81 = arith.mulf %79, %80 : vector<4x32xf32>
    %82 = vector.broadcast %8 : vector<4x1xf32> to vector<4x32xf32>
    %83 = arith.addf %81, %82 : vector<4x32xf32>
    %cst_30 = arith.constant 0.000000e+00 : f32
    %84 = vector.broadcast %cst_30 : f32 to vector<4x32xf32>
    %85 = arith.maximumf %83, %84 : vector<4x32xf32>
    %cst_31 = arith.constant dense<0.000000e+00> : vector<16x32xf32>
    %86 = tpu.matmul %2, %85, %cst_31 {dimension_numbers = #tpu.dot_dimension_numbers<[1], [0], [0], [1], [0, 0, 1, 1], [], []>} : vector<16x4xf32>, vector<4x32xf32>, vector<16x32xf32> -> vector<16x32xf32>
    %cst_32 = arith.constant dense<0.000000e+00> : vector<32xf32>
    %87 = vector.multi_reduction <add>, %86, %cst_32 [0] : vector<16x32xf32> to vector<32xf32>
    %88 = vector.shape_cast %87 : vector<32xf32> to vector<1x32xf32>
    %cst_33 = arith.constant 6.250000e-02 : f32
    %89 = vector.broadcast %cst_33 : f32 to vector<1x32xf32>
    %90 = arith.mulf %88, %89 : vector<1x32xf32>
    %91 = vector.broadcast %90 : vector<1x32xf32> to vector<16x32xf32>
    %92 = arith.subf %86, %91 : vector<16x32xf32>
    %93 = arith.mulf %92, %92 : vector<16x32xf32>
    %cst_34 = arith.constant dense<0.000000e+00> : vector<32xf32>
    %94 = vector.multi_reduction <add>, %93, %cst_34 [0] : vector<16x32xf32> to vector<32xf32>
    %95 = vector.shape_cast %94 : vector<32xf32> to vector<1x32xf32>
    %cst_35 = arith.constant 6.250000e-02 : f32
    %96 = vector.broadcast %cst_35 : f32 to vector<1x32xf32>
    %97 = arith.mulf %95, %96 : vector<1x32xf32>
    %cst_36 = arith.constant 9.99999974E-6 : f32
    %98 = vector.broadcast %cst_36 : f32 to vector<1x32xf32>
    %99 = arith.addf %97, %98 : vector<1x32xf32>
    %100 = math.rsqrt %99 : vector<1x32xf32>
    %101 = vector.broadcast %100 : vector<1x32xf32> to vector<16x32xf32>
    %102 = arith.mulf %92, %101 : vector<16x32xf32>
    %103 = vector.broadcast %9 : vector<16x1xf32> to vector<16x32xf32>
    %104 = arith.mulf %102, %103 : vector<16x32xf32>
    %105 = vector.broadcast %10 : vector<16x1xf32> to vector<16x32xf32>
    %106 = arith.addf %104, %105 : vector<16x32xf32>
    %107 = arith.addf %106, %32 : vector<16x32xf32>
    %cst_37 = arith.constant 0.000000e+00 : f32
    %108 = vector.broadcast %cst_37 : f32 to vector<16x32xf32>
    %109 = arith.maximumf %107, %108 : vector<16x32xf32>
    %c0_38 = arith.constant 0 : index
    %c0_39 = arith.constant 0 : index
    %110 = vector.load %arg7[%c0_38, %c0_39] : memref<16x32xf32, #tpu.memory_space<vmem>>, vector<16x32xf32>
    tpu.vector_store %arg7[%c0_38, %c0_39], %109 {strides = array<i32>} : memref<16x32xf32, #tpu.memory_space<vmem>>, vector<16x32xf32>,
    return
  }
  func.func @transform_0(%arg0: i32) -> (i32, i32) {
    %c0_i32 = arith.constant 0 : i32
    %c0_i32_0 = arith.constant 0 : i32
    return %c0_i32, %arg0 : i32, i32
  }
  func.func @transform_1(%arg0: i32) -> (i32, i32) {
    %c0_i32 = arith.constant 0 : i32
    %c0_i32_0 = arith.constant 0 : i32
    %c0_i32_1 = arith.constant 0 : i32
    return %c0_i32, %c0_i32_0 : i32, i32
  }
  func.func @transform_2(%arg0: i32) -> (i32, i32) {
    %c0_i32 = arith.constant 0 : i32
    %c0_i32_0 = arith.constant 0 : i32
    %c0_i32_1 = arith.constant 0 : i32
    return %c0_i32, %c0_i32_0 : i32, i32
  }
  func.func @transform_3(%arg0: i32) -> (i32, i32) {
    %c0_i32 = arith.constant 0 : i32
    %c0_i32_0 = arith.constant 0 : i32
    %c0_i32_1 = arith.constant 0 : i32
    return %c0_i32, %c0_i32_0 : i32, i32
  }
  func.func @transform_4(%arg0: i32) -> (i32, i32) {
    %c0_i32 = arith.constant 0 : i32
    %c0_i32_0 = arith.constant 0 : i32
    %c0_i32_1 = arith.constant 0 : i32
    return %c0_i32, %c0_i32_0 : i32, i32
  }
  func.func @transform_5(%arg0: i32) -> (i32, i32) {
    %c0_i32 = arith.constant 0 : i32
    %c0_i32_0 = arith.constant 0 : i32
    %c0_i32_1 = arith.constant 0 : i32
    return %c0_i32, %c0_i32_0 : i32, i32
  }
  func.func @transform_6(%arg0: i32) -> (i32, i32) {
    %c0_i32 = arith.constant 0 : i32
    %c0_i32_0 = arith.constant 0 : i32
    return %c0_i32, %arg0 : i32, i32
  }
}

</mosaic_0001>

<bundles_post_ra>
// kernel: tpu_custom_call.1
= control target key start
LH: loop header
LB: loop body
LE: loop exit
PB: predicated region body
PF: predicated region fallthrough
CT: control target
= control target key end

     0   :  { %vm49_vm0 = vcmask 130048   ;;  %v380_v3 = vmov 0   ;;  %s490_s0 = inlined_call_operand.vmem [shape: f32[16,32], index: 0, kind: input, shape index: {}]   ;;  %s491_s1 = inlined_call_operand.vmem [shape: f32[4,16], index: 1, kind: input, shape index: {}]   ;;  %s492_s2 = inlined_call_operand.vmem [shape: f32[4,12], index: 2, kind: input, shape index: {}]   ;;  %s493_s3 = inlined_call_operand.vmem [shape: f32[16,4], index: 3, kind: input, shape index: {}]   ;;  %s494_s4 = inlined_call_operand.vmem [shape: f32[4,4], index: 4, kind: input, shape index: {}]   ;;  %s495_s5 = inlined_call_operand.vmem [shape: f32[16,2], index: 5, kind: input, shape index: {}]   ;;  %s496_s6 = inlined_call_operand.hbm [shape: f32[16,32], index: 6, kind: output, shape index: {}]  }
   0x1   :  { %v428_v0 = vld [vmem:[%s490_s0 + $0x8] sm:$0xff]  ;;  %v433_v1 = vld [vmem:[%s490_s0] sm:$0xff]  ;;  %339 = vset.pattern.permute.xlu0 %v380_v3 }
   0x2   :  { %v24_v2 = vld [vmem:[%s491_s1] sm:$0xf]  ;;  %67 = vmatpush.msra.mxu0 %v428_v0 }
   0x3   :  { %v443_v4 = vld [vmem:[%s494_s4] sm:$0xf] }
   0x4   :  { %11 = vsyncpa [#allocation3], 0  ;;  %106 = vperm.xlu0 %339, %v443_v4   ;;  %68 = vmatpush.msra.mxu0 %v433_v1  ;;  %v381_v5 = vmov 1   ;;  %vm73_vm1 = vcmask 257024   ;;  %s382_s0 = smov 32   ;;  %vm116_vm5 = vcmask 1047808   ;;  %v31_v45 = vlaneseq }
   0x5   :  { %322 = vmatmul.msk.f32.vlgmr.msra.gmra.mxu0 %vm49_vm0, %v24_v2  ;;  %s383_s1 = smov 127   ;;  %s384_s4 = smov 97   ;;  %v385_v43 = vmov 2   ;;  %v386_v44 = vmov 3   ;;  %vm135_vm7 = vcmask 1043456   ;;  %vm137_vm9 = vcmask 97280  }
   0x6   :  { %341 = vset.pattern.permute.xlu1 %v385_v43  ;;  %342 = vset.pattern.permute.xlu2 %v386_v44  ;;  %v32_v46 = vand.u32 127, %v31_v45  ;;  %v25_v53 = vld [vmem:[%s492_s2] sm:$0xf]  ;;  %vm205_vm13 = vcmask 31744   ;;  %vm238_vm14 = vcmask 261120   ;;  %s310_s16 = sshll.u32 %s496_s6, 4  ;;  %s311_s16 = int_to_ptr.hbm [resolvable:$true] %s310_s16 }
   0x7   :  { %s388_s17 = smov 128   ;;  %s389_s18 = smov 8  }
   0x8   :  { %v37_v47 = vand.u32 15, %v32_v46 }
   0xa   :  { %vm46_vm6 = vcmp.eq.s32.totalorder %v37_v47, 15  ;;  %vm45_vm8 = vcmp.eq.s32.totalorder %v37_v47, 0 }
   0xc   :  { %340 = vset.pattern.permute.xlu0 %v381_v5 }
   0xd   :  { %111 = vperm.xlu0 %340, %v443_v4  }
  0x15   :  { %343 = vset.pattern.permute.xlu0 %v380_v3 }
  0x76   :  { %v107_v28 = vpop.permute.xlu0 %106 }
  0x7f   :  { %v112_v35 = vpop.permute.xlu0 %111 }
  0x82   :  { %v70_v6 = vpop.f32.mrf.mxu0 }
  0x83   :  { %v74_v7 = vsel %vm73_vm1, %v70_v6, 0.0 }
  0x84   :  { %v75_v8 = vrot.slane %v74_v7, 4 }
  0x86   :  { %v76_v9 = vadd.f32 %v75_v8, %v74_v7 }
  0x88   :  { %v77_v10 = vrot.slane %v76_v9, 2 }
  0x8a   :  { %v78_v11 = vadd.f32 %v77_v10, %v76_v9 }
  0x8c   :  { %v79_v12 = vrot.slane %v78_v11, 1 }
  0x8e   :  { %v80_v13 = vadd.f32 %v79_v12, %v78_v11  ;;  %v30_v12 = vld [vmem:[%s495_s5 + $0x8] sm:$0xff] }
  0x90   :  { %v81_v14 = vmul.f32 0.25, %v80_v13  ;;  %v29_v13 = vld [vmem:[%s495_s5] sm:$0xff] }
  0x91   :  { %278 = vperm.xlu0 %343, %v29_v13  }
  0x92   :  { %v82_v15 = vsub.f32 %v70_v6, %v81_v14 }
  0x94   :  { %v83_v16 = vmul.f32 %v82_v15, %v82_v15 }
  0x96   :  { %v84_v17 = vsel %vm73_vm1, %v83_v16, 0.0 }
  0x97   :  { %v85_v18 = vrot.slane %v84_v17, 4 }
  0x99   :  { %v86_v19 = vadd.f32 %v85_v18, %v84_v17  ;;  %347 = vset.pattern.permute.xlu0 %v381_v5 }
  0x9b   :  { %v87_v20 = vrot.slane %v86_v19, 2 }
  0x9d   :  { %v88_v21 = vadd.f32 %v87_v20, %v86_v19 }
  0x9f   :  { %v89_v22 = vrot.slane %v88_v21, 1 }
  0xa1   :  { %v90_v23 = vadd.f32 %v89_v22, %v88_v21 }
  0xa3   :  { %v91_v24 = vmul.f32 0.25, %v90_v23 }
  0xa5   :  { %v92_v25 = vadd.f32 1e-05, %v91_v24 }
  0xa7   :  { %348 = vrsqrt.f32 %v92_v25  ;;  %vm99_vm3 = vweird.f32 %v92_v25 }
  0xad   :  { %v349_v26 = vpop.eup %348 }
  0xae   :  { %v94_v27 = vmul.f32 %v349_v26, %v92_v25  ;;  %vm100_vm2 = vweird.f32 %v349_v26 }
  0xaf   :  { %vm101_vm4 = vmor %vm99_vm3, %vm100_vm2 }
  0xb0   :  { %v95_v29 = vmul.f32 %v349_v26, %v94_v27 }
  0xb2   :  { %v96_v30 = vmul.f32 0.5, %v95_v29  ;;  %v27_v29 = vld [vmem:[%s493_s3 + $0x8] sm:$0xff] }
  0xb4   :  { %v97_v31 = vsub.f32 1.5, %v96_v30 }
  0xb6   :  { %v98_v32 = vmul.f32 %v349_v26, %v97_v31 }
  0xb8   :  { %v102_v33 = vsel %vm101_vm4, %v349_v26, %v98_v32 }
  0xb9   :  { %v103_v34 = vmul.f32 %v102_v33, %v82_v15 }
  0xbb   :  { %v109_v36 = vmul.f32 %v107_v28, %v103_v34 }
  0xbd   :  { %v114_v37 = vadd.f32 %v112_v35, %v109_v36 }
  0xbf   :  { %v115_v38 = vmax.f32 %v114_v37, 0.0 }
  0xc1   :  { %117 = vrot.lane.b32.xlu1 %v115_v38, %s382_s0  ;;  %v133_v51 = vrot.slane %v115_v38, 4 }
 0x133   :  { %v118_v39 = vpop.permute.xlu1 %117 }
 0x134   :  { %v119_v40 = vsel %vm116_vm5, %v118_v39, %v115_v38 }
 0x135   :  { %120 = vrot.lane.b32.xlu1 %v119_v40, %s382_s0 }
 0x13d   :  { %195 = vperm.xlu1 %341, %v443_v4  }
 0x145   :  { %344 = vset.pattern.permute.xlu1 %v380_v3 }
 0x146   :  { %283 = vperm.xlu1 %344, %v30_v12  }
 0x14e   :  { %346 = vset.pattern.permute.xlu1 %v381_v5 }
 0x14f   :  { %293 = vperm.xlu1 %346, %v30_v12  }
 0x1a7   :  { %v121_v41 = vpop.permute.xlu1 %120 }
 0x1a8   :  { %v122_v42 = vsel %vm116_vm5, %v121_v41, %v115_v38 }
 0x1a9   :  { %128 = vrot.lane.b32.xlu2 %v122_v42, %s383_s1 }
 0x1af   :  { %v196_v22 = vpop.permute.xlu1 %195 }
 0x1b1   :  { %124 = vrot.lane.b32.xlu2 %v122_v42, %s384_s4 }
 0x1b9   :  { %200 = vperm.xlu2 %342, %v443_v4  }
 0x1c1   :  { %345 = vset.pattern.permute.xlu2 %v381_v5  ;;  %v26_v5 = vld [vmem:[%s493_s3] sm:$0xff]  ;;  %s387_s3 = smov [#allocation2]  }
 0x1c2   :  { %289 = vperm.xlu2 %345, %v29_v13   ;;  %s308_s13 = sshll.u32 %s387_s3, 4  ;;  %s309_s13 = int_to_ptr.vmem [resolvable:$true] %s308_s13 }
 0x203   :  { %v129_v48 = vpop.permute.xlu2 %128 }
 0x204   :  { %v131_v49 = vsel %vm46_vm6, 0.0, %v129_v48 }
 0x205   :  { %323 = vmatpush.msk.msra.mxu1 %vm135_vm7, %v131_v49 }
 0x20b   :  { %v125_v50 = vpop.permute.xlu2 %124 }
 0x20c   :  { %v127_v52 = vsel %vm45_vm8, 0.0, %v125_v50 }
 0x20d   :  { %v136_v54 = vsel %vm135_vm7, %v127_v52, %v133_v51 }
 0x20e   :  { %159 = vmatpush.msra.mxu1 %v136_v54 }
 0x20f   :  { %324 = vmatmul.msk.f32.vlgmr.msra.gmra.mxu1 %vm137_vm9, %v25_v53 }
 0x213   :  { %v201_v25 = vpop.permute.xlu2 %200 }
 0x28c   :  { %v161_v55 = vpop.f32.mrf.mxu1 }
 0x28d   :  { %v164_v56 = vsel %vm73_vm1, %v161_v55, 0.0 }
 0x28e   :  { %v165_v57 = vrot.slane %v164_v56, 4 }
 0x290   :  { %v166_v58 = vadd.f32 %v165_v57, %v164_v56 }
 0x292   :  { %v167_v59 = vrot.slane %v166_v58, 2 }
 0x294   :  { %v168_v60 = vadd.f32 %v167_v59, %v166_v58  ;;  %v284_v59 = vpop.permute.xlu1 %283 }
 0x296   :  { %v169_v61 = vrot.slane %v168_v60, 1 }
 0x298   :  { %v170_v62 = vadd.f32 %v169_v61, %v168_v60 }
 0x29a   :  { %v171_v63 = vmul.f32 0.25, %v170_v62 }
 0x29c   :  { %v172_v2 = vsub.f32 %v161_v55, %v171_v63 }
 0x29e   :  { %v173_v3 = vmul.f32 %v172_v2, %v172_v2 }
 0x2a0   :  { %v174_v4 = vsel %vm73_vm1, %v173_v3, 0.0  ;;  %v279_v3 = vpop.permute.xlu0 %278 }
 0x2a1   :  { %v175_v6 = vrot.slane %v174_v4, 4 }
 0x2a3   :  { %v176_v7 = vadd.f32 %v175_v6, %v174_v4 }
 0x2a5   :  { %v177_v8 = vrot.slane %v176_v7, 2 }
 0x2a7   :  { %v178_v9 = vadd.f32 %v177_v8, %v176_v7  ;;  %v290_v7 = vpop.permute.xlu2 %289  ;;  %v294_v8 = vpop.permute.xlu1 %293 }
 0x2a9   :  { %v179_v10 = vrot.slane %v178_v9, 1 }
 0x2ab   :  { %v180_v11 = vadd.f32 %v179_v10, %v178_v9 }
 0x2ad   :  { %v181_v14 = vmul.f32 0.25, %v180_v11 }
 0x2af   :  { %v182_v15 = vadd.f32 1e-05, %v181_v14 }
 0x2b1   :  { %350 = vrsqrt.f32 %v182_v15  ;;  %vm189_vm11 = vweird.f32 %v182_v15 }
 0x2b7   :  { %v351_v16 = vpop.eup %350 }
 0x2b8   :  { %v184_v17 = vmul.f32 %v351_v16, %v182_v15  ;;  %vm190_vm10 = vweird.f32 %v351_v16 }
 0x2b9   :  { %vm191_vm12 = vmor %vm189_vm11, %vm190_vm10 }
 0x2ba   :  { %v185_v18 = vmul.f32 %v351_v16, %v184_v17 }
 0x2bc   :  { %v186_v19 = vmul.f32 0.5, %v185_v18 }
 0x2be   :  { %v187_v20 = vsub.f32 1.5, %v186_v19 }
 0x2c0   :  { %v188_v21 = vmul.f32 %v351_v16, %v187_v20 }
 0x2c2   :  { %v192_v23 = vsel %vm191_vm12, %v351_v16, %v188_v21 }
 0x2c3   :  { %v193_v24 = vmul.f32 %v192_v23, %v172_v2 }
 0x2c5   :  { %v198_v26 = vmul.f32 %v196_v22, %v193_v24 }
 0x2c7   :  { %v203_v27 = vadd.f32 %v201_v25, %v198_v26 }
 0x2c9   :  { %v204_v28 = vmax.f32 %v203_v27, 0.0 }
 0x2cb   :  { %325 = vmatpush.msk.msra.mxu2 %vm135_vm7, %v204_v28  ;;  %328 = vmatpush.msk.msra.mxu3 %vm135_vm7, %v204_v28 }
 0x2cc   :  { %326 = vmatmul.msk.f32.vlgmr.msra.gmra.mxu2 %vm205_vm13, %v26_v5  ;;  %327 = vmatmul.msk.f32.vlgmr.msra.gmra.mxu3 %vm205_vm13, %v27_v29 }
 0x34f   :  { %v232_v30 = vpop.f32.mrf.mxu2  ;;  %v235_v31 = vpop.f32.mrf.mxu3 }
 0x350   :  { %v239_v32 = vsel %vm238_vm14, %v232_v30, 0.0  ;;  %v240_v33 = vsel %vm238_vm14, %v235_v31, 0.0 }
 0x351   :  { %v241_v34 = vadd.f32 %v240_v33, %v239_v32 }
 0x353   :  { %v242_v35 = vrot.slane %v241_v34, 4 }
 0x355   :  { %v243_v36 = vadd.f32 %v242_v35, %v241_v34 }
 0x357   :  { %v244_v37 = vrot.slane %v243_v36, 2 }
 0x359   :  { %v245_v38 = vadd.f32 %v244_v37, %v243_v36 }
 0x35b   :  { %v246_v39 = vrot.slane %v245_v38, 1 }
 0x35d   :  { %v247_v40 = vadd.f32 %v246_v39, %v245_v38 }
 0x35f   :  { %v248_v41 = vmul.f32 0.0625, %v247_v40 }
 0x361   :  { %v249_v42 = vsub.f32 %v232_v30, %v248_v41  ;;  %v250_v43 = vsub.f32 %v235_v31, %v248_v41 }
 0x363   :  { %v251_v44 = vmul.f32 %v249_v42, %v249_v42  ;;  %v252_v45 = vmul.f32 %v250_v43, %v250_v43 }
 0x365   :  { %v253_v46 = vsel %vm238_vm14, %v251_v44, 0.0  ;;  %v254_v47 = vsel %vm238_vm14, %v252_v45, 0.0 }
 0x366   :  { %v255_v48 = vadd.f32 %v254_v47, %v253_v46 }
 0x368   :  { %v256_v49 = vrot.slane %v255_v48, 4 }
 0x36a   :  { %v257_v50 = vadd.f32 %v256_v49, %v255_v48 }
 0x36c   :  { %v258_v51 = vrot.slane %v257_v50, 2 }
 0x36e   :  { %v259_v52 = vadd.f32 %v258_v51, %v257_v50 }
 0x370   :  { %v260_v53 = vrot.slane %v259_v52, 1 }
 0x372   :  { %v261_v54 = vadd.f32 %v260_v53, %v259_v52 }
 0x374   :  { %v262_v55 = vmul.f32 0.0625, %v261_v54 }
 0x376   :  { %v263_v56 = vadd.f32 1e-05, %v262_v55 }
 0x378   :  { %352 = vrsqrt.f32 %v263_v56  ;;  %vm270_vm0 = vweird.f32 %v263_v56 }
 0x37e   :  { %v353_v57 = vpop.eup %352 }
 0x37f   :  { %v265_v58 = vmul.f32 %v353_v57, %v263_v56  ;;  %vm271_vm15 = vweird.f32 %v353_v57 }
 0x380   :  { %vm272_vm1 = vmor %vm270_vm0, %vm271_vm15 }
 0x381   :  { %v266_v60 = vmul.f32 %v353_v57, %v265_v58 }
 0x383   :  { %v267_v61 = vmul.f32 0.5, %v266_v60 }
 0x385   :  { %v268_v62 = vsub.f32 1.5, %v267_v61 }
 0x387   :  { %v269_v63 = vmul.f32 %v353_v57, %v268_v62 }
 0x389   :  { %v273_v2 = vsel %vm272_vm1, %v353_v57, %v269_v63 }
 0x38a   :  { %v275_v4 = vmul.f32 %v273_v2, %v250_v43  ;;  %v274_v6 = vmul.f32 %v273_v2, %v249_v42 }
 0x38c   :  { %v287_v9 = vmul.f32 %v284_v59, %v275_v4  ;;  %v286_v10 = vmul.f32 %v279_v3, %v274_v6 }
 0x38e   :  { %v296_v11 = vadd.f32 %v290_v7, %v286_v10  ;;  %v297_v12 = vadd.f32 %v294_v8, %v287_v9 }
 0x390   :  { %v298_v13 = vadd.f32 %v296_v11, %v433_v1  ;;  %v299_v14 = vadd.f32 %v297_v12, %v428_v0 }
 0x392   :  { %v300_v15 = vmax.f32 %v298_v13, 0.0  ;;  %v301_v16 = vmax.f32 %v299_v14, 0.0 }
 0x394   :  { %302 = vst.msk [vmem:[#allocation2] sm:$0xff] %vm238_vm14, %v300_v15 }
 0x395   :  { %303 = vst.msk [vmem:[#allocation2 + $0x8] sm:$0xff] %vm238_vm14, %v301_v16 }
 0x396   :  { %316 = dma.vmem_to_hbm [thread:$0]  %s309_s13, 256, %s311_s16, [#allocation3], %s388_s17, %s388_s17, %s389_s18  }
 0x397   :  { %378 = dma.done.wait [#allocation3], 256  }
 0x398   :  { %379 = vsyncadd [#allocation3], 4294967040 }
 0x399   :  { %321 = vsyncpa [#allocation3], 1 }

</bundles_post_ra>
